<compile_context>
chip_gen: v6e
topology: v6e:2x2x1
jax: 0.10.0
libtpu: 0.0.40
codegen_flags: <defaults>
</compile_context>

<pallas_src>
import jax
import jax.numpy as jnp
import numpy as np
from jax.experimental import pallas as pl
from jax.experimental.pallas import tpu as pltpu

_LANES = 128
_SUBLANES = 8
_MAX_TILE_ROWS = 2048                   # 2048 x 128 x 4B = 1 MiB per f32 tile
_VMEM_TILE_BUDGET = 10 * 1024 * 1024    # 2x-buffered tiles stay well under v5e's 16 MiB


def _round_up(a, b):
    return ((a + b - 1) // b) * b


def _make_kernel(k, w_scaled, tiles_per_core, num_tiles, need_guard):
    """Fused kernel for k deep-supervision outputs + shared target y.

    Refs: (x_0 .. x_{k-1}, y, out). `out` block (8,128) is the per-core accumulator
    (same block index across the trailing 'arbitrary' axis)."""

    def kernel(*refs):
        x_refs = refs[:k]
        y_ref = refs[k]
        o_ref = refs[k + 1]

        t = pl.program_id(1)

        @pl.when(t == 0)
        def _():
            o_ref[...] = jnp.zeros_like(o_ref)

        def accumulate():
            # Shared target tile: loaded once per row tile, reused for all K outputs.
            y = y_ref[...].astype(jnp.float32)
            partial = jnp.zeros((_SUBLANES, _LANES), jnp.float32)
            for i in range(k):                      # static (unrolled) loop over outputs
                d = x_refs[i][...].astype(jnp.float32) - y
                # (tile_r,128) -> (tile_r/8,8,128) -> elementwise-add down to (8,128):
                # stays on the VPU, no cross-lane XLU reduction in the hot loop.
                partial = partial + jnp.float32(w_scaled[i]) * jnp.sum(
                    (d * d).reshape(-1, _SUBLANES, _LANES), axis=0)
            o_ref[...] = o_ref[...] + partial

        if need_guard:
            # Uneven tile split across cores: skip the (at most one) dummy step.
            global_t = pl.program_id(0) * tiles_per_core + t
            pl.when(global_t < num_tiles)(accumulate)
        else:
            accumulate()

    return kernel


def multiple_output_loss2(xs, y, weight_factors=None, max_tile_rows=_MAX_TILE_ROWS):
    """Fused deep-supervision MSE loss: sum_i w_i * mean((x_i - y)^2). Returns scalar f32."""
    k_all = len(xs)
    if weight_factors is None:
        w_all = [1.0] * k_all
    else:
        w_all = [float(w) for w in weight_factors]
    assert len(w_all) == k_all

    # Match PyTorch semantics: x[0] always contributes; outputs i>=1 with weight 0
    # are skipped entirely (their blocks are never DMA'd).
    keep = [0] + [i for i in range(1, k_all) if w_all[i] != 0.0]
    xs_k = [xs[i] for i in keep]
    k = len(xs_k)

    numel = int(np.prod(y.shape))
    inv_count = 1.0 / float(numel)
    w_scaled = tuple(w_all[i] * inv_count for i in keep)   # fold 1/numel into weights

    # --- row tiling ------------------------------------------------------------
    rows_raw = -(-numel // _LANES)                          # cdiv(numel, 128)
    budget_rows = _VMEM_TILE_BUDGET // (2 * (k + 1) * _LANES * 4)
    cap = max(_SUBLANES,
              min(int(max_tile_rows), (budget_rows // _SUBLANES) * _SUBLANES))

    if rows_raw <= cap:
        tile_r = _round_up(rows_raw, _SUBLANES)
    else:
        # Prefer a tile that divides the row count exactly so no wrapper-side pad
        # (a full extra HBM copy per input) is needed.
        tile_r = 0
        lo = max(_SUBLANES, (cap // 4 // _SUBLANES) * _SUBLANES)
        for tr in range(cap, lo - 1, -_SUBLANES):
            if rows_raw % tr == 0:
                tile_r = tr
                break
        if tile_r == 0:
            tile_r = cap    # fallback: pad (rare, awkward row counts only)
    rows = _round_up(rows_raw, tile_r)
    pad = rows * _LANES - numel

    num_tiles = rows // tile_r
    n_cores = 1 if num_tiles < 2 else 2          # v7x has 2 TCs; harmless elsewhere
    tiles_per_core = -(-num_tiles // n_cores)
    need_guard = (tiles_per_core * n_cores != num_tiles)

    def to_slab(a):
        # x and y are padded identically with zeros => diff == 0 in the pad region,
        # so the pad contributes nothing to the sum of squared errors.
        flat = a.reshape(-1)
        if pad:
            flat = jnp.pad(flat, (0, pad))
        return flat.reshape(rows, _LANES)

    x_slabs = [to_slab(x) for x in xs_k]
    y_slab = to_slab(y)

    if need_guard:
        def xmap(p, t):
            return (jnp.minimum(p * tiles_per_core + t, num_tiles - 1), 0)
    else:
        def xmap(p, t):
            return (p * tiles_per_core + t, 0)

    row_spec = pl.BlockSpec((tile_r, _LANES), xmap)
    out_spec = pl.BlockSpec((_SUBLANES, _LANES), lambda p, t: (p, 0))

    bytes_accessed = sum(int(np.prod(x.shape)) * x.dtype.itemsize for x in xs_k)
    bytes_accessed += numel * y.dtype.itemsize + n_cores * _SUBLANES * _LANES * 4
    cost = pl.CostEstimate(flops=3 * k * numel, transcendentals=0,
                           bytes_accessed=int(bytes_accessed))

    partials = pl.pallas_call(
        _make_kernel(k, w_scaled, tiles_per_core, num_tiles, need_guard),
        out_shape=jax.ShapeDtypeStruct((n_cores * _SUBLANES, _LANES), jnp.float32),
        grid=(n_cores, tiles_per_core),
        in_specs=[row_spec] * k + [row_spec],
        out_specs=out_spec,
        compiler_params=pltpu.CompilerParams(
            # first axis splits row tiles across TensorCores; second axis carries
            # the per-core (8,128) accumulator => sequential.
            dimension_semantics=("parallel", "arbitrary")),
        cost_estimate=cost,
    )(*x_slabs, y_slab)

    # Tiny final reduce (<= 2 KiB) of the per-core (8,128) partials; weights already
    # include the 1/numel MSE normalization.
    return jnp.sum(partials)


def _reference(xs, y, weight_factors=None):
    k = len(xs)
    w = [1.0] * k if weight_factors is None else list(weight_factors)
    total = w[0] * jnp.mean((xs[0].astype(jnp.float32) - y.astype(jnp.float32)) ** 2)
    for i in range(1, k):
        if w[i] != 0:
            total = total + w[i] * jnp.mean(
                (xs[i].astype(jnp.float32) - y.astype(jnp.float32)) ** 2)
    return total


if __name__ == "__main__":
    key = jax.random.PRNGKey(0)

    # --- main demo: NCHW deep-supervision, 4 outputs, last one zero-weighted ----
    N, C, H, W = 2, 4, 16, 16
    K = 4
    keys = jax.random.split(key, K + 1)
    xs = [jax.random.normal(keys[i], (N, C, H, W), dtype=jnp.float32) for i in range(K)]
    y = jax.random.normal(keys[K], (N, C, H, W), dtype=jnp.float32)
    weight_factors = [1.0, 0.5, 0.25, 0.0]   # weight 0 -> that output is skipped

    loss = jax.block_until_ready(multiple_output_loss2(xs, y, weight_factors))
    ref = jax.block_until_ready(_reference(xs, y, weight_factors))
    np.testing.assert_allclose(np.asarray(loss), np.asarray(ref), rtol=1e-5, atol=1e-5)

    # --- exercise the uneven two-core split path (odd tile count, guarded step) --
    keys2 = jax.random.split(jax.random.PRNGKey(1), 4)
    xs2 = [jax.random.normal(keys2[i], (2, 4, 16, 24), dtype=jnp.float32) for i in range(3)]
    y2 = jax.random.normal(keys2[3], (2, 4, 16, 24), dtype=jnp.float32)
    loss2 = jax.block_until_ready(multiple_output_loss2(xs2, y2, None, max_tile_rows=8))
    ref2 = jax.block_until_ready(_reference(xs2, y2, None))
    np.testing.assert_allclose(np.asarray(loss2), np.asarray(ref2), rtol=1e-5, atol=1e-5)

    # --- exercise the lane-padding path (numel not a multiple of 128) -----------
    keys3 = jax.random.split(jax.random.PRNGKey(2), 3)
    xs3 = [jax.random.normal(keys3[i], (2, 3, 7, 11), dtype=jnp.float32) for i in range(2)]
    y3 = jax.random.normal(keys3[2], (2, 3, 7, 11), dtype=jnp.float32)
    w3 = [1.0, 0.3]
    loss3 = jax.block_until_ready(multiple_output_loss2(xs3, y3, w3))
    ref3 = jax.block_until_ready(_reference(xs3, y3, w3))
    np.testing.assert_allclose(np.asarray(loss3), np.asarray(ref3), rtol=1e-5, atol=1e-5)

    print("KERNEL_OK")
</pallas_src>

<mosaic_0001>
module attributes {stable_mosaic.version = 11 : i64} {
  func.func @kernel(%arg0: i32, %arg1: i32, %arg2: memref<16x128xf32, #tpu.memory_space<vmem>>, %arg3: memref<16x128xf32, #tpu.memory_space<vmem>>, %arg4: memref<16x128xf32, #tpu.memory_space<vmem>>, %arg5: memref<16x128xf32, #tpu.memory_space<vmem>>, %arg6: memref<8x128xf32, #tpu.memory_space<vmem>>) attributes {dimension_semantics = [#tpu.dimension_semantics<parallel>, #tpu.dimension_semantics<arbitrary>], iteration_bounds = array<i64: 1, 1>, scalar_prefetch = 0 : i64, scratch_operands = 0 : i64, tpu.core_type = #tpu.core_type<tc>, window_params = [{transform_indices = @transform_0, window_bounds = array<i64: 16, 128>}, {transform_indices = @transform_1, window_bounds = array<i64: 16, 128>}, {transform_indices = @transform_2, window_bounds = array<i64: 16, 128>}, {transform_indices = @transform_3, window_bounds = array<i64: 16, 128>}, {transform_indices = @transform_4, window_bounds = array<i64: 8, 128>}]} {
    %c0_i32 = arith.constant 0 : i32
    %0 = arith.cmpi eq, %arg1, %c0_i32 : i32
    %1 = arith.extui %0 : i1 to i32
    %c0_i32_0 = arith.constant 0 : i32
    %2 = arith.cmpi ne, %1, %c0_i32_0 : i32
    scf.if %2 {
      %cst_18 = arith.constant 0.000000e+00 : f32
      %32 = vector.broadcast %cst_18 : f32 to vector<8x128xf32>
      %c0_19 = arith.constant 0 : index
      %c0_20 = arith.constant 0 : index
      %33 = vector.load %arg6[%c0_19, %c0_20] : memref<8x128xf32, #tpu.memory_space<vmem>>, vector<8x128xf32>
      tpu.vector_store %arg6[%c0_19, %c0_20], %32 {strides = array<i32>} : memref<8x128xf32, #tpu.memory_space<vmem>>, vector<8x128xf32>,
    } else {
    }
    %c0 = arith.constant 0 : index
    %c0_1 = arith.constant 0 : index
    %3 = vector.load %arg5[%c0, %c0_1] : memref<16x128xf32, #tpu.memory_space<vmem>>, vector<16x128xf32>
    %cst = arith.constant 0.000000e+00 : f32
    %4 = vector.broadcast %cst : f32 to vector<8x128xf32>
    %c0_2 = arith.constant 0 : index
    %c0_3 = arith.constant 0 : index
    %5 = vector.load %arg2[%c0_2, %c0_3] : memref<16x128xf32, #tpu.memory_space<vmem>>, vector<16x128xf32>
    %6 = arith.subf %5, %3 : vector<16x128xf32>
    %7 = arith.mulf %6, %6 : vector<16x128xf32>
    %8 = vector.shape_cast %7 : vector<16x128xf32> to vector<2x8x128xf32>
    %cst_4 = arith.constant dense<0.000000e+00> : vector<8x128xf32>
    %9 = vector.multi_reduction <add>, %8, %cst_4 [0] : vector<2x8x128xf32> to vector<8x128xf32>
    %cst_5 = arith.constant 4.8828125E-4 : f32
    %10 = vector.broadcast %cst_5 : f32 to vector<8x128xf32>
    %11 = arith.mulf %10, %9 : vector<8x128xf32>
    %12 = arith.addf %4, %11 : vector<8x128xf32>
    %c0_6 = arith.constant 0 : index
    %c0_7 = arith.constant 0 : index
    %13 = vector.load %arg3[%c0_6, %c0_7] : memref<16x128xf32, #tpu.memory_space<vmem>>, vector<16x128xf32>
    %14 = arith.subf %13, %3 : vector<16x128xf32>
    %15 = arith.mulf %14, %14 : vector<16x128xf32>
    %16 = vector.shape_cast %15 : vector<16x128xf32> to vector<2x8x128xf32>
    %cst_8 = arith.constant dense<0.000000e+00> : vector<8x128xf32>
    %17 = vector.multi_reduction <add>, %16, %cst_8 [0] : vector<2x8x128xf32> to vector<8x128xf32>
    %cst_9 = arith.constant 2.44140625E-4 : f32
    %18 = vector.broadcast %cst_9 : f32 to vector<8x128xf32>
    %19 = arith.mulf %18, %17 : vector<8x128xf32>
    %20 = arith.addf %12, %19 : vector<8x128xf32>
    %c0_10 = arith.constant 0 : index
    %c0_11 = arith.constant 0 : index
    %21 = vector.load %arg4[%c0_10, %c0_11] : memref<16x128xf32, #tpu.memory_space<vmem>>, vector<16x128xf32>
    %22 = arith.subf %21, %3 : vector<16x128xf32>
    %23 = arith.mulf %22, %22 : vector<16x128xf32>
    %24 = vector.shape_cast %23 : vector<16x128xf32> to vector<2x8x128xf32>
    %cst_12 = arith.constant dense<0.000000e+00> : vector<8x128xf32>
    %25 = vector.multi_reduction <add>, %24, %cst_12 [0] : vector<2x8x128xf32> to vector<8x128xf32>
    %cst_13 = arith.constant 1.22070313E-4 : f32
    %26 = vector.broadcast %cst_13 : f32 to vector<8x128xf32>
    %27 = arith.mulf %26, %25 : vector<8x128xf32>
    %28 = arith.addf %20, %27 : vector<8x128xf32>
    %c0_14 = arith.constant 0 : index
    %c0_15 = arith.constant 0 : index
    %29 = vector.load %arg6[%c0_14, %c0_15] : memref<8x128xf32, #tpu.memory_space<vmem>>, vector<8x128xf32>
    %30 = arith.addf %29, %28 : vector<8x128xf32>
    %c0_16 = arith.constant 0 : index
    %c0_17 = arith.constant 0 : index
    %31 = vector.load %arg6[%c0_16, %c0_17] : memref<8x128xf32, #tpu.memory_space<vmem>>, vector<8x128xf32>
    tpu.vector_store %arg6[%c0_16, %c0_17], %30 {strides = array<i32>} : memref<8x128xf32, #tpu.memory_space<vmem>>, vector<8x128xf32>,
    return
  }
  func.func @transform_0(%arg0: i32, %arg1: i32) -> (i32, i32) {
    %c1_i32 = arith.constant 1 : i32
    %0 = arith.muli %arg0, %c1_i32 : i32
    %1 = arith.addi %0, %arg1 : i32
    %c0_i32 = arith.constant 0 : i32
    %c0_i32_0 = arith.constant 0 : i32
    return %1, %c0_i32 : i32, i32
  }
  func.func @transform_1(%arg0: i32, %arg1: i32) -> (i32, i32) {
    %c1_i32 = arith.constant 1 : i32
    %0 = arith.muli %arg0, %c1_i32 : i32
    %1 = arith.addi %0, %arg1 : i32
    %c0_i32 = arith.constant 0 : i32
    %c0_i32_0 = arith.constant 0 : i32
    return %1, %c0_i32 : i32, i32
  }
  func.func @transform_2(%arg0: i32, %arg1: i32) -> (i32, i32) {
    %c1_i32 = arith.constant 1 : i32
    %0 = arith.muli %arg0, %c1_i32 : i32
    %1 = arith.addi %0, %arg1 : i32
    %c0_i32 = arith.constant 0 : i32
    %c0_i32_0 = arith.constant 0 : i32
    return %1, %c0_i32 : i32, i32
  }
  func.func @transform_3(%arg0: i32, %arg1: i32) -> (i32, i32) {
    %c1_i32 = arith.constant 1 : i32
    %0 = arith.muli %arg0, %c1_i32 : i32
    %1 = arith.addi %0, %arg1 : i32
    %c0_i32 = arith.constant 0 : i32
    %c0_i32_0 = arith.constant 0 : i32
    return %1, %c0_i32 : i32, i32
  }
  func.func @transform_4(%arg0: i32, %arg1: i32) -> (i32, i32) {
    %c0_i32 = arith.constant 0 : i32
    %c0_i32_0 = arith.constant 0 : i32
    return %arg0, %c0_i32 : i32, i32
  }
}

</mosaic_0001>

<bundles_post_ra>
// kernel: tpu_custom_call.1
= control target key start
LH: loop header
LB: loop body
LE: loop exit
PB: predicated region body
PF: predicated region fallthrough
CT: control target
= control target key end

     0   :  { %9 = vsyncpa [#allocation3], 0  ;;  %s326_s0 = inlined_call_operand.hbm [shape: f32[16,128], index: 0, kind: input, shape index: {}]   ;;  %s327_s1 = inlined_call_operand.hbm [shape: f32[16,128], index: 1, kind: input, shape index: {}]   ;;  %s328_s2 = inlined_call_operand.hbm [shape: f32[16,128], index: 2, kind: input, shape index: {}]   ;;  %s329_s3 = inlined_call_operand.hbm [shape: f32[16,128], index: 3, kind: input, shape index: {}]   ;;  %s330_s4 = inlined_call_operand.hbm [shape: f32[8,128], index: 4, kind: output, shape index: {}]  }
   0x1   :  { %10 = vsyncpa [#allocation6], 0 }
   0x2   :  { %11 = vsyncpa [#allocation9], 0 }
   0x3   :  { %12 = vsyncpa [#allocation4], 0  ;;  %s267_s15 = smov [#allocation5]   ;;  %s268_s17 = smov [#allocation2]  }
   0x4   :  { %s38_s16 = sshll.u32 %s267_s15, 4  ;;  %s22_s18 = sshll.u32 %s268_s17, 4  ;;  %s39_s16 = int_to_ptr.vmem [resolvable:$true] %s38_s16  ;;  %s23_s18 = int_to_ptr.vmem [resolvable:$true] %s22_s18 }
   0x5   :  { %s167_s19 = scalar_lea.vmem %s39_s16, 256  ;;  %p172_p1 = scmp.lt.s32.totalorder %s39_s16, %s39_s16 }
   0x6   :  { %p168_p0 = scmp.ne.s32.totalorder %s39_s16, %s167_s19  ;;  %p173_p2 = scmp.lt.s32.totalorder %s167_s19, %s167_s19 }
   0x8   :  { %p174_p3 = por %p173_p2, %p172_p1 }
   0xa   :  { %p175_p4 = pnand %p174_p3, %p168_p0 }
   0xc   :  { %178 = shalt.err (!%p175_p4)
}
   0xd   :  { %s269_s20 = smov 128   ;;  %s270_s21 = smov 8  }
   0xe   :  { %44 = dma.hbm_to_vmem [thread:$0]  %s327_s1, 256, %s39_s16, [#allocation6], %s269_s20, %s269_s20, %s270_s21  }
   0xf   :  { %s187_s24 = scalar_lea.vmem %s23_s18, 256  ;;  %p192_p6 = scmp.lt.s32.totalorder %s23_s18, %s23_s18 }
  0x10   :  { %p188_p5 = scmp.ne.s32.totalorder %s23_s18, %s187_s24  ;;  %p193_p7 = scmp.lt.s32.totalorder %s187_s24, %s187_s24 }
  0x12   :  { %p194_p8 = por %p193_p7, %p192_p6 }
  0x14   :  { %p195_p9 = pnand %p194_p8, %p188_p5 }
  0x16   :  { %198 = shalt.err (!%p195_p9)
}
  0x17   :  { %28 = dma.hbm_to_vmem [thread:$0]  %s326_s0, 256, %s23_s18, [#allocation3], %s269_s20, %s269_s20, %s270_s21  }
  0x18   :  { %s271_s27 = smov [#allocation7]   ;;  %s272_s29 = smov [#allocation8]  }
  0x19   :  { %s54_s28 = sshll.u32 %s271_s27, 4  ;;  %s70_s30 = sshll.u32 %s272_s29, 4  ;;  %s55_s28 = int_to_ptr.vmem [resolvable:$true] %s54_s28  ;;  %s71_s30 = int_to_ptr.vmem [resolvable:$true] %s70_s30 }
  0x1a   :  { %s207_s1 = scalar_lea.vmem %s55_s28, 256  ;;  %p212_p11 = scmp.lt.s32.totalorder %s55_s28, %s55_s28 }
  0x1b   :  { %p208_p10 = scmp.ne.s32.totalorder %s55_s28, %s207_s1  ;;  %p213_p12 = scmp.lt.s32.totalorder %s207_s1, %s207_s1 }
  0x1d   :  { %p214_p13 = por %p213_p12, %p212_p11 }
  0x1f   :  { %p215_p0 = pnand %p214_p13, %p208_p10 }
  0x21   :  { %218 = shalt.err (!%p215_p0)
}
  0x22   :  { %60 = dma.hbm_to_vmem [thread:$0]  %s328_s2, 256, %s55_s28, [#allocation6], %s269_s20, %s269_s20, %s270_s21  }
  0x23   :  { %s227_s0 = scalar_lea.vmem %s71_s30, 256  ;;  %p232_p2 = scmp.lt.s32.totalorder %s71_s30, %s71_s30 }
  0x24   :  { %p228_p1 = scmp.ne.s32.totalorder %s71_s30, %s227_s0  ;;  %p233_p3 = scmp.lt.s32.totalorder %s227_s0, %s227_s0 }
  0x26   :  { %p234_p4 = por %p233_p3, %p232_p2 }
  0x28   :  { %p235_p5 = pnand %p234_p4, %p228_p1 }
  0x2a   :  { %238 = shalt.err (!%p235_p5)
}
  0x2b   :  { %76 = dma.hbm_to_vmem [thread:$0]  %s329_s3, 256, %s71_s30, [#allocation9], %s269_s20, %s269_s20, %s270_s21  }
  0x2c   :  { %259 = dma.done.wait [#allocation3], 256  }
  0x2d   :  { %260 = vsyncadd [#allocation3], 4294967040 }
  0x2e   :  { %261 = dma.done.wait [#allocation6], 512  }
  0x2f   :  { %262 = vsyncadd [#allocation6], 4294966784 }
  0x30   :  { %263 = dma.done.wait [#allocation9], 256  }
  0x31   :  { %264 = vsyncadd [#allocation9], 4294967040  ;;  %v102_v0 = vld [vmem:[#allocation8] sm:$0xff]  ;;  %v103_v1 = vld [vmem:[#allocation8 + $0x8] sm:$0xff]  ;;  %s273_s2 = smov [#allocation10]  }
  0x32   :  { %v104_v2 = vld [vmem:[#allocation2] sm:$0xff]  ;;  %v105_v3 = vld [vmem:[#allocation2 + $0x8] sm:$0xff]  ;;  %v113_v5 = vld [vmem:[#allocation5] sm:$0xff]  ;;  %s140_s3 = sshll.u32 %s273_s2, 4  ;;  %s141_s3 = int_to_ptr.vmem [resolvable:$true] %s140_s3 }
  0x33   :  { %v106_v4 = vsub.f32 %v104_v2, %v102_v0  ;;  %v114_v6 = vld [vmem:[#allocation5 + $0x8] sm:$0xff]  ;;  %v107_v7 = vsub.f32 %v105_v3, %v103_v1  ;;  %v115_v8 = vsub.f32 %v113_v5, %v102_v0  ;;  %v122_v10 = vld [vmem:[#allocation7] sm:$0xff]  ;;  %v123_v11 = vld [vmem:[#allocation7 + $0x8] sm:$0xff]  ;;  %s239_s9 = scalar_lea.vmem %s141_s3, 128  ;;  %p244_p7 = scmp.lt.s32.totalorder %s141_s3, %s141_s3 }
  0x34   :  { %v116_v9 = vsub.f32 %v114_v6, %v103_v1  ;;  %v124_v13 = vsub.f32 %v122_v10, %v102_v0  ;;  %v125_v14 = vsub.f32 %v123_v11, %v103_v1  ;;  %p240_p6 = scmp.ne.s32.totalorder %s141_s3, %s239_s9  ;;  %p245_p8 = scmp.lt.s32.totalorder %s239_s9, %s239_s9 }
  0x35   :  { %v108_v12 = vmul.f32 %v106_v4, %v106_v4  ;;  %v109_v15 = vmul.f32 %v107_v7, %v107_v7  ;;  %v117_v16 = vmul.f32 %v115_v8, %v115_v8 }
  0x36   :  { %v118_v17 = vmul.f32 %v116_v9, %v116_v9  ;;  %v126_v18 = vmul.f32 %v124_v13, %v124_v13  ;;  %v127_v19 = vmul.f32 %v125_v14, %v125_v14  ;;  %p246_p9 = por %p245_p8, %p244_p7 }
  0x37   :  { %v110_v20 = vadd.f32 %v109_v15, %v108_v12 }
  0x38   :  { %v119_v21 = vadd.f32 %v118_v17, %v117_v16  ;;  %v128_v22 = vadd.f32 %v127_v19, %v126_v18  ;;  %p247_p10 = pnand %p246_p9, %p240_p6 }
  0x39   :  { %v111_v23 = vmul.f32 0.00048828125, %v110_v20 }
  0x3a   :  { %v120_v24 = vmul.f32 0.00024414063, %v119_v21  ;;  %v129_v25 = vmul.f32 0.00012207031, %v128_v22 }
  0x3c   :  { %v121_v26 = vadd.f32 %v120_v24, %v111_v23 }
  0x3e   :  { %v130_v27 = vadd.f32 %v129_v25, %v121_v26 }
  0x40   :  { %133 = vst [vmem:[#allocation10] sm:$0xff] %v130_v27 }
  0x41   :  { %250 = shalt.err (!%p247_p10)
}
  0x42   :  { %143 = dma.vmem_to_hbm [thread:$0]  %s141_s3, 128, %s330_s4, [#allocation4]  }
  0x43   :  { %265 = dma.done.wait [#allocation4], 128  }
  0x44   :  { %266 = vsyncadd [#allocation4], 4294967168 }
  0x45   :  { %147 = vsyncpa [#allocation3], 1 }
  0x46   :  { %148 = vsyncpa [#allocation6], 1 }
  0x47   :  { %149 = vsyncpa [#allocation9], 1 }
  0x48   :  { %150 = vsyncpa [#allocation4], 1 }

</bundles_post_ra>
